<compile_context>
chip_gen: v6e
topology: v6e:2x2x1
jax: 0.10.0
libtpu: 0.0.40
codegen_flags: <defaults>
</compile_context>

<pallas_src>
import functools

import jax
import jax.numpy as jnp
from jax.experimental import pallas as pl
from jax.experimental.pallas import tpu as pltpu

_INV_SQRT2 = 0.7071067811865476
_SQRT_2_OVER_PI = 0.7978845608028654


def _round_up(n, m):
    return ((n + m - 1) // m) * m


def _vmem_capacity_bytes():
    try:
        return int(pltpu.get_tpu_info().vmem_capacity_bytes)
    except Exception:
        return 64 << 20  # conservative (v7x-sized) fallback


def _gelu(x, approximate):
    if approximate:
        # tanh-approx GELU: tanh lowers to the EUP slot (VALU relief on v6e/v7x).
        # Opt-in only — it does NOT match nn.GELU()'s exact erf bit-for-bit.
        return 0.5 * x * (1.0 + jnp.tanh(_SQRT_2_OVER_PI * (x + 0.044715 * x * x * x)))
    # PyTorch nn.GELU() default: exact erf-based GELU, computed in f32.
    return 0.5 * x * (1.0 + jax.lax.erf(x * _INV_SQRT2))


def _mlp_kernel(x_ref, w1_ref, b1_ref, w2_ref, b2_ref, o_ref, acc_ref, *,
                approximate_gelu):
    # One (block_m, D_pad) row tile x one tile_h hidden chunk:
    #   fc1 chunk -> bias -> GELU -> fc2 partial-sum accumulated in f32 scratch.
    # Dropout is identity in eval mode.
    hi = pl.program_id(1)

    @pl.when(hi == 0)
    def _init():
        acc_ref[...] = jnp.zeros_like(acc_ref)

    # Cast x in-kernel (hidden under MXU time) instead of a wrapper HBM pass.
    x = x_ref[...].astype(w1_ref.dtype)
    h = jnp.dot(x, w1_ref[...], preferred_element_type=jnp.float32) + b1_ref[...]
    h = _gelu(h, approximate_gelu).astype(w2_ref.dtype)      # fused downcast
    acc_ref[...] += jnp.dot(h, w2_ref[...], preferred_element_type=jnp.float32)

    @pl.when(hi == pl.num_programs(1) - 1)
    def _finalize():
        o_ref[...] = (acc_ref[...] + b2_ref[...]).astype(o_ref.dtype)
    # TODO(synk): training-mode Dropout (p=0.1) omitted — forward implemented in
    # eval mode where nn.Dropout is the identity.


def prepare_params(w1, b1, w2, b2, compute_dtype=jnp.bfloat16):
    """Pad feature dims to lane multiples and cast ONCE (amortized across calls).

    Weights are stored (in, out) so the kernel computes x @ W + b (equivalent to
    PyTorch's x @ W.T + b). Zero padding is exact: padded reduction rows/cols
    contribute nothing and padded output columns are sliced off.
    """
    D, H = w1.shape
    D_pad = _round_up(D, 128)
    H_pad = _round_up(H, 128)
    w1p = jnp.pad(w1, ((0, D_pad - D), (0, H_pad - H))).astype(compute_dtype)
    w2p = jnp.pad(w2, ((0, H_pad - H), (0, D_pad - D))).astype(compute_dtype)
    b1p = jnp.pad(b1.reshape(1, -1), ((0, 0), (0, H_pad - H))).astype(jnp.float32)
    b2p = jnp.pad(b2.reshape(1, -1), ((0, 0), (0, D_pad - D))).astype(jnp.float32)
    return w1p, b1p, w2p, b2p


@functools.partial(
    jax.jit,
    static_argnames=("block_m", "tile_h", "approximate_gelu",
                     "single_buffer_weights"))
def mlp_forward(x, w1p, b1p, w2p, b2p, *, block_m=512, tile_h=None,
                approximate_gelu=False, single_buffer_weights=True):
    B, S, D = x.shape
    M = B * S
    D_pad, H_pad = w1p.shape
    out_dtype = x.dtype
    csize = jnp.dtype(w1p.dtype).itemsize
    xsize = jnp.dtype(x.dtype).itemsize
    osize = jnp.dtype(out_dtype).itemsize

    # ---- row tile: multiple of 8 (or the full row count). When one tile would
    # cover everything, split it in two so both v7x TensorCores get rows.
    bm = min(block_m, M)
    if bm < M:
        bm = max(8, (bm // 8) * 8)
    elif M > 8:
        half = _round_up(pl.cdiv(M, 2), 8)
        if half < M:
            bm = half
    grid_m = pl.cdiv(M, bm)

    # ---- hidden-dim tile + VMEM budget (chip-aware, with headroom).
    vmem_cap = int(0.8 * _vmem_capacity_bytes())

    def footprint(th, gh):
        wbuf = 1 if (single_buffer_weights and gh == 1) else 2
        f = wbuf * (2 * D_pad * th * csize + th * 4) + D_pad * 4   # W1, W2, b1, b2
        f += 2 * bm * D_pad * (xsize + osize)                       # pipelined x / out
        f += bm * D_pad * 4                                         # f32 accumulator
        f += bm * th * (4 + csize)                                  # f32 h slab + cast
        return f

    if tile_h is None:
        th = H_pad
        if footprint(H_pad, 1) > vmem_cap:
            for cand in (2048, 1024, 512, 256, 128):
                if cand < H_pad and H_pad % cand == 0:
                    th = cand
                    if footprint(cand, H_pad // cand) <= vmem_cap:
                        break
    else:
        th = tile_h
        if H_pad % th != 0:
            raise ValueError("tile_h must evenly divide the padded hidden dim")
    grid_h = H_pad // th

    vmem_limit = int(min(vmem_cap, max(32 << 20, int(1.4 * footprint(th, grid_h)))))

    # ---- x: no wrapper-side cast; pad the feature dim only if it is unaligned
    # (never for standard ViT dims, so typically zero extra HBM passes over x).
    x2d = x.reshape(M, D)
    if D_pad != D:
        x2d = jnp.pad(x2d, ((0, 0), (0, D_pad - D)))

    const_weights = single_buffer_weights and grid_h == 1

    def wspec(shape, idx):
        # When the weight block never changes, single-buffer it to halve the
        # resident weight VMEM; otherwise use default double buffering so the
        # next hidden chunk's DMA overlaps compute.
        if const_weights:
            return pl.BlockSpec(shape, idx, pipeline_mode=pl.Buffered(1))
        return pl.BlockSpec(shape, idx)

    cost = pl.CostEstimate(
        flops=int(4 * M * D_pad * H_pad),                 # two matmuls
        transcendentals=int(M * H_pad),                   # erf / tanh per h elem
        bytes_accessed=int(M * D_pad * (xsize + osize)
                           + 2 * D_pad * H_pad * csize + (H_pad + D_pad) * 4),
    )

    out2d = pl.pallas_call(
        functools.partial(_mlp_kernel, approximate_gelu=approximate_gelu),
        out_shape=jax.ShapeDtypeStruct((M, D_pad), out_dtype),
        grid_spec=pltpu.PrefetchScalarGridSpec(
            num_scalar_prefetch=0,
            grid=(grid_m, grid_h),                               # reduction axis last
            in_specs=[
                pl.BlockSpec((bm, D_pad), lambda i, h: (i, 0)),  # x row tile
                wspec((D_pad, th), lambda i, h: (0, h)),         # W1 (in, out)
                wspec((1, th), lambda i, h: (0, h)),             # b1
                wspec((th, D_pad), lambda i, h: (h, 0)),         # W2 (in, out)
                wspec((1, D_pad), lambda i, h: (0, 0)),          # b2
            ],
            out_specs=pl.BlockSpec((bm, D_pad), lambda i, h: (i, 0)),
            scratch_shapes=[pltpu.VMEM((bm, D_pad), jnp.float32)],
        ),
        compiler_params=pltpu.CompilerParams(
            dimension_semantics=("parallel", "arbitrary"),
            vmem_limit_bytes=vmem_limit,
        ),
        cost_estimate=cost,
    )(x2d, w1p, b1p, w2p, b2p)

    return out2d[:, :D].reshape(B, S, D)


def init_params(key, embed_dim, mlp_ratio, dtype=jnp.float32):
    hidden_dim = int(embed_dim * mlp_ratio)
    k1, k2, k3, k4 = jax.random.split(key, 4)
    # nn.Linear default init: U(-1/sqrt(fan_in), 1/sqrt(fan_in)); weights stored (in, out).
    lim1 = 1.0 / (embed_dim ** 0.5)
    lim2 = 1.0 / (hidden_dim ** 0.5)
    w1 = jax.random.uniform(k1, (embed_dim, hidden_dim), dtype, -lim1, lim1)
    b1 = jax.random.uniform(k2, (hidden_dim,), dtype, -lim1, lim1)
    w2 = jax.random.uniform(k3, (hidden_dim, embed_dim), dtype, -lim2, lim2)
    b2 = jax.random.uniform(k4, (embed_dim,), dtype, -lim2, lim2)
    return w1, b1, w2, b2


if __name__ == "__main__":
    key = jax.random.PRNGKey(0)
    kx, kp, kx2, kp2 = jax.random.split(key, 4)

    def reference(x, w1, b1, w2, b2):
        D = x.shape[-1]
        h = jax.nn.gelu(x.reshape(-1, D) @ w1 + b1, approximate=False)
        return (h @ w2 + b2).reshape(x.shape)

    def run(x, prepared, **kw):
        try:
            out = mlp_forward(x, *prepared, **kw)
        except Exception:
            # Fallback if this JAX build rejects single-buffered BlockSpecs.
            out = mlp_forward(x, *prepared, single_buffer_weights=False, **kw)
        return jax.block_until_ready(out)

    # --- Test 1: resident-weight path (grid over rows only) ---
    batch, seq, embed_dim, mlp_ratio = 2, 8, 32, 4.0
    x = jax.random.normal(kx, (batch, seq, embed_dim), jnp.float32)
    w1, b1, w2, b2 = init_params(kp, embed_dim, mlp_ratio)
    ref = reference(x, w1, b1, w2, b2)

    # f32 compute path is the correctness gate (tight tolerance).
    p_f32 = prepare_params(w1, b1, w2, b2, compute_dtype=jnp.float32)
    out_f32 = run(x, p_f32)
    assert jnp.allclose(out_f32, ref, atol=1e-5, rtol=1e-5), "f32 mismatch"

    # bf16 MXU path (recommended perf config): f32 accumulation, modest tolerance.
    p_bf16 = prepare_params(w1, b1, w2, b2, compute_dtype=jnp.bfloat16)
    out_bf16 = run(x, p_bf16)
    assert jnp.allclose(out_bf16, ref, atol=5e-2, rtol=5e-2), "bf16 mismatch"

    # --- Test 2: hidden-dim tiling / accumulator path (grid_h > 1) ---
    embed_dim2, mlp_ratio2 = 64, 4.0
    x2 = jax.random.normal(kx2, (batch, seq, embed_dim2), jnp.float32)
    w1b, b1b, w2b, b2b = init_params(kp2, embed_dim2, mlp_ratio2)
    ref2 = reference(x2, w1b, b1b, w2b, b2b)
    p2 = prepare_params(w1b, b1b, w2b, b2b, compute_dtype=jnp.float32)
    out2 = run(x2, p2, tile_h=128)   # H_pad=256 -> grid_h=2, exercises accumulation
    assert jnp.allclose(out2, ref2, atol=1e-4, rtol=1e-4), "H-tiled mismatch"

    print("KERNEL_OK")
</pallas_src>

<mosaic_0001>
module attributes {stable_mosaic.version = 11 : i64} {
  func.func @_mlp_kernel(%arg0: i32, %arg1: i32, %arg2: memref<8x128xf32, #tpu.memory_space<vmem>>, %arg3: memref<128x128xf32, #tpu.memory_space<vmem>>, %arg4: memref<1x128xf32, #tpu.memory_space<vmem>>, %arg5: memref<128x128xf32, #tpu.memory_space<vmem>>, %arg6: memref<1x128xf32, #tpu.memory_space<vmem>>, %arg7: memref<8x128xf32, #tpu.memory_space<vmem>>, %arg8: memref<8x128xf32, #tpu.memory_space<vmem>>) attributes {dimension_semantics = [#tpu.dimension_semantics<parallel>, #tpu.dimension_semantics<arbitrary>], iteration_bounds = array<i64: 2, 1>, scalar_prefetch = 0 : i64, scratch_operands = 1 : i64, tpu.core_type = #tpu.core_type<tc>, window_params = [{transform_indices = @transform_0, window_bounds = array<i64: 8, 128>}, {pipeline_mode = #tpu.pipeline_mode<synchronous>, transform_indices = @transform_1, window_bounds = array<i64: 128, 128>}, {pipeline_mode = #tpu.pipeline_mode<synchronous>, transform_indices = @transform_2, window_bounds = array<i64: 1, 128>}, {pipeline_mode = #tpu.pipeline_mode<synchronous>, transform_indices = @transform_3, window_bounds = array<i64: 128, 128>}, {pipeline_mode = #tpu.pipeline_mode<synchronous>, transform_indices = @transform_4, window_bounds = array<i64: 1, 128>}, {transform_indices = @transform_5, window_bounds = array<i64: 8, 128>}]} {
    %c0_i32 = arith.constant 0 : i32
    %0 = arith.cmpi eq, %arg1, %c0_i32 : i32
    %1 = arith.extui %0 : i1 to i32
    %c0_i32_0 = arith.constant 0 : i32
    %2 = arith.cmpi ne, %1, %c0_i32_0 : i32
    scf.if %2 {
      %cst_18 = arith.constant 0.000000e+00 : f32
      %25 = vector.broadcast %cst_18 : f32 to vector<8x128xf32>
      %c0_19 = arith.constant 0 : index
      %c0_20 = arith.constant 0 : index
      %26 = vector.load %arg8[%c0_19, %c0_20] : memref<8x128xf32, #tpu.memory_space<vmem>>, vector<8x128xf32>
      tpu.vector_store %arg8[%c0_19, %c0_20], %25 {strides = array<i32>} : memref<8x128xf32, #tpu.memory_space<vmem>>, vector<8x128xf32>,
    } else {
    }
    %c0 = arith.constant 0 : index
    %c0_1 = arith.constant 0 : index
    %3 = vector.load %arg2[%c0, %c0_1] : memref<8x128xf32, #tpu.memory_space<vmem>>, vector<8x128xf32>
    %c0_2 = arith.constant 0 : index
    %c0_3 = arith.constant 0 : index
    %4 = vector.load %arg3[%c0_2, %c0_3] : memref<128x128xf32, #tpu.memory_space<vmem>>, vector<128x128xf32>
    %cst = arith.constant dense<0.000000e+00> : vector<8x128xf32>
    %5 = tpu.matmul %3, %4, %cst {dimension_numbers = #tpu.dot_dimension_numbers<[1], [0], [0], [1], [0, 0, 1, 1], [], []>} : vector<8x128xf32>, vector<128x128xf32>, vector<8x128xf32> -> vector<8x128xf32>
    %c0_4 = arith.constant 0 : index
    %c0_5 = arith.constant 0 : index
    %6 = vector.load %arg4[%c0_4, %c0_5] : memref<1x128xf32, #tpu.memory_space<vmem>>, vector<1x128xf32>
    %7 = vector.broadcast %6 : vector<1x128xf32> to vector<8x128xf32>
    %8 = arith.addf %5, %7 : vector<8x128xf32>
    %cst_6 = arith.constant 5.000000e-01 : f32
    %9 = vector.broadcast %cst_6 : f32 to vector<8x128xf32>
    %10 = arith.mulf %9, %8 : vector<8x128xf32>
    %cst_7 = arith.constant 0.707106769 : f32
    %11 = vector.broadcast %cst_7 : f32 to vector<8x128xf32>
    %12 = arith.mulf %8, %11 : vector<8x128xf32>
    %13 = math.erf %12 : vector<8x128xf32>
    %cst_8 = arith.constant 1.000000e+00 : f32
    %14 = vector.broadcast %cst_8 : f32 to vector<8x128xf32>
    %15 = arith.addf %14, %13 : vector<8x128xf32>
    %16 = arith.mulf %10, %15 : vector<8x128xf32>
    %c0_9 = arith.constant 0 : index
    %c0_10 = arith.constant 0 : index
    %17 = vector.load %arg8[%c0_9, %c0_10] : memref<8x128xf32, #tpu.memory_space<vmem>>, vector<8x128xf32>
    %c0_11 = arith.constant 0 : index
    %c0_12 = arith.constant 0 : index
    %18 = vector.load %arg5[%c0_11, %c0_12] : memref<128x128xf32, #tpu.memory_space<vmem>>, vector<128x128xf32>
    %cst_13 = arith.constant dense<0.000000e+00> : vector<8x128xf32>
    %19 = tpu.matmul %16, %18, %cst_13 {dimension_numbers = #tpu.dot_dimension_numbers<[1], [0], [0], [1], [0, 0, 1, 1], [], []>} : vector<8x128xf32>, vector<128x128xf32>, vector<8x128xf32> -> vector<8x128xf32>
    %20 = arith.addf %17, %19 : vector<8x128xf32>
    %c0_14 = arith.constant 0 : index
    %c0_15 = arith.constant 0 : index
    %21 = vector.load %arg8[%c0_14, %c0_15] : memref<8x128xf32, #tpu.memory_space<vmem>>, vector<8x128xf32>
    tpu.vector_store %arg8[%c0_14, %c0_15], %20 {strides = array<i32>} : memref<8x128xf32, #tpu.memory_space<vmem>>, vector<8x128xf32>,
    %c0_i32_16 = arith.constant 0 : i32
    %22 = arith.cmpi eq, %arg1, %c0_i32_16 : i32
    %23 = arith.extui %22 : i1 to i32
    %c0_i32_17 = arith.constant 0 : i32
    %24 = arith.cmpi ne, %23, %c0_i32_17 : i32
    scf.if %24 {
      %c0_18 = arith.constant 0 : index
      %c0_19 = arith.constant 0 : index
      %25 = vector.load %arg8[%c0_18, %c0_19] : memref<8x128xf32, #tpu.memory_space<vmem>>, vector<8x128xf32>
      %c0_20 = arith.constant 0 : index
      %c0_21 = arith.constant 0 : index
      %26 = vector.load %arg6[%c0_20, %c0_21] : memref<1x128xf32, #tpu.memory_space<vmem>>, vector<1x128xf32>
      %27 = vector.broadcast %26 : vector<1x128xf32> to vector<8x128xf32>
      %28 = arith.addf %25, %27 : vector<8x128xf32>
      %c0_22 = arith.constant 0 : index
      %c0_23 = arith.constant 0 : index
      %29 = vector.load %arg7[%c0_22, %c0_23] : memref<8x128xf32, #tpu.memory_space<vmem>>, vector<8x128xf32>
      tpu.vector_store %arg7[%c0_22, %c0_23], %28 {strides = array<i32>} : memref<8x128xf32, #tpu.memory_space<vmem>>, vector<8x128xf32>,
    } else {
    }
    return
  }
  func.func @transform_0(%arg0: i32, %arg1: i32) -> (i32, i32) {
    %c0_i32 = arith.constant 0 : i32
    %c0_i32_0 = arith.constant 0 : i32
    return %arg0, %c0_i32 : i32, i32
  }
  func.func @transform_1(%arg0: i32, %arg1: i32) -> (i32, i32) {
    %c0_i32 = arith.constant 0 : i32
    %c0_i32_0 = arith.constant 0 : i32
    return %c0_i32, %arg1 : i32, i32
  }
  func.func @transform_2(%arg0: i32, %arg1: i32) -> (i32, i32) {
    %c0_i32 = arith.constant 0 : i32
    %c0_i32_0 = arith.constant 0 : i32
    return %c0_i32, %arg1 : i32, i32
  }
  func.func @transform_3(%arg0: i32, %arg1: i32) -> (i32, i32) {
    %c0_i32 = arith.constant 0 : i32
    %c0_i32_0 = arith.constant 0 : i32
    return %arg1, %c0_i32 : i32, i32
  }
  func.func @transform_4(%arg0: i32, %arg1: i32) -> (i32, i32) {
    %c0_i32 = arith.constant 0 : i32
    %c0_i32_0 = arith.constant 0 : i32
    %c0_i32_1 = arith.constant 0 : i32
    return %c0_i32, %c0_i32_0 : i32, i32
  }
  func.func @transform_5(%arg0: i32, %arg1: i32) -> (i32, i32) {
    %c0_i32 = arith.constant 0 : i32
    %c0_i32_0 = arith.constant 0 : i32
    return %arg0, %c0_i32 : i32, i32
  }
}

module attributes {stable_mosaic.version = 11 : i64} {
  func.func @_mlp_kernel(%arg0: i32, %arg1: i32, %arg2: memref<8x128xf32, #tpu.memory_space<vmem>>, %arg3: memref<128x128xf32, #tpu.memory_space<vmem>>, %arg4: memref<1x128xf32, #tpu.memory_space<vmem>>, %arg5: memref<128x128xf32, #tpu.memory_space<vmem>>, %arg6: memref<1x128xf32, #tpu.memory_space<vmem>>, %arg7: memref<8x128xf32, #tpu.memory_space<vmem>>, %arg8: memref<8x128xf32, #tpu.memory_space<vmem>>) attributes {dimension_semantics = [#tpu.dimension_semantics<parallel>, #tpu.dimension_semantics<arbitrary>], iteration_bounds = array<i64: 2, 1>, scalar_prefetch = 0 : i64, scratch_operands = 1 : i64, tpu.core_type = #tpu.core_type<tc>, window_params = [{transform_indices = @transform_0, window_bounds = array<i64: 8, 128>}, {transform_indices = @transform_1, window_bounds = array<i64: 128, 128>}, {transform_indices = @transform_2, window_bounds = array<i64: 1, 128>}, {transform_indices = @transform_3, window_bounds = array<i64: 128, 128>}, {pipeline_mode = #tpu.pipeline_mode<synchronous>, transform_indices = @transform_4, window_bounds = array<i64: 1, 128>}, {transform_indices = @transform_5, window_bounds = array<i64: 8, 128>}]} {
    %c0_i32 = arith.constant 0 : i32
    %0 = arith.cmpi eq, %arg1, %c0_i32 : i32
    %1 = arith.extui %0 : i1 to i32
    %c0_i32_0 = arith.constant 0 : i32
    %2 = arith.cmpi ne, %1, %c0_i32_0 : i32
    scf.if %2 {
      %cst_18 = arith.constant 0.000000e+00 : f32
      %25 = vector.broadcast %cst_18 : f32 to vector<8x128xf32>
      %c0_19 = arith.constant 0 : index
      %c0_20 = arith.constant 0 : index
      %26 = vector.load %arg8[%c0_19, %c0_20] : memref<8x128xf32, #tpu.memory_space<vmem>>, vector<8x128xf32>
      tpu.vector_store %arg8[%c0_19, %c0_20], %25 {strides = array<i32>} : memref<8x128xf32, #tpu.memory_space<vmem>>, vector<8x128xf32>,
    } else {
    }
    %c0 = arith.constant 0 : index
    %c0_1 = arith.constant 0 : index
    %3 = vector.load %arg2[%c0, %c0_1] : memref<8x128xf32, #tpu.memory_space<vmem>>, vector<8x128xf32>
    %c0_2 = arith.constant 0 : index
    %c0_3 = arith.constant 0 : index
    %4 = vector.load %arg3[%c0_2, %c0_3] : memref<128x128xf32, #tpu.memory_space<vmem>>, vector<128x128xf32>
    %cst = arith.constant dense<0.000000e+00> : vector<8x128xf32>
    %5 = tpu.matmul %3, %4, %cst {dimension_numbers = #tpu.dot_dimension_numbers<[1], [0], [0], [1], [0, 0, 1, 1], [], []>} : vector<8x128xf32>, vector<128x128xf32>, vector<8x128xf32> -> vector<8x128xf32>
    %c0_4 = arith.constant 0 : index
    %c0_5 = arith.constant 0 : index
    %6 = vector.load %arg4[%c0_4, %c0_5] : memref<1x128xf32, #tpu.memory_space<vmem>>, vector<1x128xf32>
    %7 = vector.broadcast %6 : vector<1x128xf32> to vector<8x128xf32>
    %8 = arith.addf %5, %7 : vector<8x128xf32>
    %cst_6 = arith.constant 5.000000e-01 : f32
    %9 = vector.broadcast %cst_6 : f32 to vector<8x128xf32>
    %10 = arith.mulf %9, %8 : vector<8x128xf32>
    %cst_7 = arith.constant 0.707106769 : f32
    %11 = vector.broadcast %cst_7 : f32 to vector<8x128xf32>
    %12 = arith.mulf %8, %11 : vector<8x128xf32>
    %13 = math.erf %12 : vector<8x128xf32>
    %cst_8 = arith.constant 1.000000e+00 : f32
    %14 = vector.broadcast %cst_8 : f32 to vector<8x128xf32>
    %15 = arith.addf %14, %13 : vector<8x128xf32>
    %16 = arith.mulf %10, %15 : vector<8x128xf32>
    %c0_9 = arith.constant 0 : index
    %c0_10 = arith.constant 0 : index
    %17 = vector.load %arg8[%c0_9, %c0_10] : memref<8x128xf32, #tpu.memory_space<vmem>>, vector<8x128xf32>
    %c0_11 = arith.constant 0 : index
    %c0_12 = arith.constant 0 : index
    %18 = vector.load %arg5[%c0_11, %c0_12] : memref<128x128xf32, #tpu.memory_space<vmem>>, vector<128x128xf32>
    %cst_13 = arith.constant dense<0.000000e+00> : vector<8x128xf32>
    %19 = tpu.matmul %16, %18, %cst_13 {dimension_numbers = #tpu.dot_dimension_numbers<[1], [0], [0], [1], [0, 0, 1, 1], [], []>} : vector<8x128xf32>, vector<128x128xf32>, vector<8x128xf32> -> vector<8x128xf32>
    %20 = arith.addf %17, %19 : vector<8x128xf32>
    %c0_14 = arith.constant 0 : index
    %c0_15 = arith.constant 0 : index
    %21 = vector.load %arg8[%c0_14, %c0_15] : memref<8x128xf32, #tpu.memory_space<vmem>>, vector<8x128xf32>
    tpu.vector_store %arg8[%c0_14, %c0_15], %20 {strides = array<i32>} : memref<8x128xf32, #tpu.memory_space<vmem>>, vector<8x128xf32>,
    %c0_i32_16 = arith.constant 0 : i32
    %22 = arith.cmpi eq, %arg1, %c0_i32_16 : i32
    %23 = arith.extui %22 : i1 to i32
    %c0_i32_17 = arith.constant 0 : i32
    %24 = arith.cmpi ne, %23, %c0_i32_17 : i32
    scf.if %24 {
      %c0_18 = arith.constant 0 : index
      %c0_19 = arith.constant 0 : index
      %25 = vector.load %arg8[%c0_18, %c0_19] : memref<8x128xf32, #tpu.memory_space<vmem>>, vector<8x128xf32>
      %c0_20 = arith.constant 0 : index
      %c0_21 = arith.constant 0 : index
      %26 = vector.load %arg6[%c0_20, %c0_21] : memref<1x128xf32, #tpu.memory_space<vmem>>, vector<1x128xf32>
      %27 = vector.broadcast %26 : vector<1x128xf32> to vector<8x128xf32>
      %28 = arith.addf %25, %27 : vector<8x128xf32>
      %c0_22 = arith.constant 0 : index
      %c0_23 = arith.constant 0 : index
      %29 = vector.load %arg7[%c0_22, %c0_23] : memref<8x128xf32, #tpu.memory_space<vmem>>, vector<8x128xf32>
      tpu.vector_store %arg7[%c0_22, %c0_23], %28 {strides = array<i32>} : memref<8x128xf32, #tpu.memory_space<vmem>>, vector<8x128xf32>,
    } else {
    }
    return
  }
  func.func @transform_0(%arg0: i32, %arg1: i32) -> (i32, i32) {
    %c0_i32 = arith.constant 0 : i32
    %c0_i32_0 = arith.constant 0 : i32
    return %arg0, %c0_i32 : i32, i32
  }
  func.func @transform_1(%arg0: i32, %arg1: i32) -> (i32, i32) {
    %c0_i32 = arith.constant 0 : i32
    %c0_i32_0 = arith.constant 0 : i32
    return %c0_i32, %arg1 : i32, i32
  }
  func.func @transform_2(%arg0: i32, %arg1: i32) -> (i32, i32) {
    %c0_i32 = arith.constant 0 : i32
    %c0_i32_0 = arith.constant 0 : i32
    return %c0_i32, %arg1 : i32, i32
  }
  func.func @transform_3(%arg0: i32, %arg1: i32) -> (i32, i32) {
    %c0_i32 = arith.constant 0 : i32
    %c0_i32_0 = arith.constant 0 : i32
    return %arg1, %c0_i32 : i32, i32
  }
  func.func @transform_4(%arg0: i32, %arg1: i32) -> (i32, i32) {
    %c0_i32 = arith.constant 0 : i32
    %c0_i32_0 = arith.constant 0 : i32
    %c0_i32_1 = arith.constant 0 : i32
    return %c0_i32, %c0_i32_0 : i32, i32
  }
  func.func @transform_5(%arg0: i32, %arg1: i32) -> (i32, i32) {
    %c0_i32 = arith.constant 0 : i32
    %c0_i32_0 = arith.constant 0 : i32
    return %arg0, %c0_i32 : i32, i32
  }
}

</mosaic_0001>

<bundles_post_ra>
// kernel: mlp_forward.1
= control target key start
LH: loop header
LB: loop body
LE: loop exit
PB: predicated region body
PF: predicated region fallthrough
CT: control target
= control target key end

     0   :  { %10 = vsyncpa [#allocation4], 0  ;;  %s1018_s0 = inlined_call_operand.vmem [shape: f32[16,128], index: 0, kind: input, shape index: {}]   ;;  %s1019_s1 = inlined_call_operand.hbm [shape: f32[128,128], index: 1, kind: input, shape index: {}]   ;;  %s1020_s2 = inlined_call_operand.vmem [shape: f32[1,128], index: 2, kind: input, shape index: {}]   ;;  %s1021_s3 = inlined_call_operand.hbm [shape: f32[128,128], index: 3, kind: input, shape index: {}]   ;;  %s1022_s4 = inlined_call_operand.vmem [shape: f32[1,128], index: 4, kind: input, shape index: {}]   ;;  %s1023_s5 = inlined_call_operand.vmem [shape: f32[16,128], index: 5, kind: output, shape index: {}]  }
   0x1   :  { %11 = vsyncpa [#allocation6], 0  ;;  %s889_s18 = smov 0   ;;  %s891_s19 = smov 0  }
   0x2   :  { %s893_s20 = smov 0  }
   0x3 LB: > { %s598_s21 = sadd.s32 4294967295, %s851_s20   ;;  %s29_s22 = sadd.s32 1, %s847_s19  ;;  %s851_s20 = sphi %s893_s20, %s17_s20   ;;  %s847_s19 = sphi %s891_s19, %s1028_s19   ;;  %s843_s18 = sphi %s889_s18, %s1027_s18  }
   0x4   : > { %p31_p0 = scmp.ge.s32.totalorder %s29_s22, 2  ;;  %p600_p1 = scmp.ge.s32.totalorder %s851_s20, 1 }
   0x5   : > { %p185_p2 = scmp.lt.s32.totalorder %s851_s20, 3  ;;  %p914_p4 = scmp.eq.s32.totalorder %s598_s21, 0 }
   0x6   : > { %s1030_s22 = smov (%p31_p0, %s29_s22), 0  ;;  %s853_s25 = smov [#allocation3]  }
   0x7   : > { %p910_p3 = pnand %p600_p1, %p185_p2  ;;  %s199_s26 = sshll.u32 %s853_s25, 4  ;;  %s200_s26 = int_to_ptr.vmem [resolvable:$true] %s199_s26 }
   0x8   : > { %s854_s28 = smov [#allocation5]   ;;  %s780_s30 = scalar_lea.vmem %s200_s26, 2048 }
   0x9   : > { %p726_p5 = pneg %p910_p3  ;;  %s221_s29 = sshll.u32 %s854_s28, 4  ;;  %s222_s29 = int_to_ptr.vmem [resolvable:$true] %s221_s29 }
   0xa   : > { %p781_p8 = scmp.ne.s32.totalorder %s200_s26, %s780_s30  ;;  %p788_p11 = scmp.lt.s32.totalorder %s200_s26, %s200_s26 }
   0xb   : > { %p922_p6 = pnand %p914_p4, %p726_p5  ;;  %p789_p12 = scmp.lt.s32.totalorder %s780_s30, %s780_s30 }
   0xd   : > { %p771_p7 = pneg %p922_p6  ;;  %p790_p13 = por %p789_p12, %p788_p11 }
   0xf   : > { %p783_p9 = pnand %p781_p8, %p771_p7 }
  0x11   : > { %p784_p10 = pneg %p783_p9 }
  0x13   : > { %p791_p0 = pnand %p790_p13, %p784_p10 }
  0x15   : > { %794 = shalt.err (!%p791_p0)
}
  0x16   : > { %s855_s6 = smov 128   ;;  %s856_s7 = smov 8  }
  0x17   : > { %729 = dma.hbm_to_vmem [thread:$0]  (!%p922_p6), %s1019_s1, 2048, %s200_s26, [#allocation4], %s855_s6, %s855_s6, %s856_s7  }
  0x18   : > { %s806_s10 = scalar_lea.vmem %s222_s29, 2048  ;;  %p814_p8 = scmp.lt.s32.totalorder %s222_s29, %s222_s29 }
  0x19   : > { %p807_p1 = scmp.ne.s32.totalorder %s222_s29, %s806_s10  ;;  %p815_p9 = scmp.lt.s32.totalorder %s806_s10, %s806_s10 }
  0x1b   : > { %p809_p2 = pnand %p807_p1, %p771_p7  ;;  %p816_p11 = por %p815_p9, %p814_p8 }
  0x1d   : > { %p810_p5 = pneg %p809_p2 }
  0x1f   : > { %p817_p10 = pnand %p816_p11, %p810_p5 }
  0x21   : > { %820 = shalt.err (!%p817_p10)
}
  0x22   : > { %732 = dma.hbm_to_vmem [thread:$0]  (!%p922_p6), %s1021_s3, 2048, %s222_s29, [#allocation6], %s855_s6, %s855_s6, %s856_s7  }
  0x23   : > { %247 = sbr.rel (%p910_p3) target bundleno = 488 (0x1e8), region = 40 }
  0x28   : > { %834 = dma.done.wait (%p914_p4), [#allocation4], 2048  }
  0x29   : > { %836 = vsyncadd (%p914_p4), [#allocation4], 4294965248 }
  0x2a   : > { %838 = dma.done.wait (%p914_p4), [#allocation6], 2048  }
  0x2b   : > { %840 = vsyncadd (%p914_p4), [#allocation6], 4294965248  ;;  %v857_v0 = vmov 0.0   ;;  %vm858_vm0 = vmmov 0   ;;  %v313_v1 = vld [vmem:[#allocation3 + $0x78] sm:$0xff]  ;;  %v312_v2 = vld [vmem:[#allocation3 + $0x70] sm:$0xff] }
  0x2c   : > { %648 = vmatprep.subr.mxu0 %v857_v0  ;;  %680 = vmatprep.mubr.msk.f32.mxu0 %vm858_vm0, %v857_v0  ;;  %v311_v3 = vld [vmem:[#allocation3 + $0x68] sm:$0xff]  ;;  %v310_v4 = vld [vmem:[#allocation3 + $0x60] sm:$0xff]  ;;  %v412_v5 = vld [vmem:[#allocation5 + $0x78] sm:$0xff]  ;;  %p280_p3 = scmp.lt.s32.totalorder %s843_s18, 1 }
  0x2d   : > { %683 = vmatprep.subr.mxu1 %v857_v0  ;;  %715 = vmatprep.mubr.msk.f32.mxu1 %vm858_vm0, %v857_v0  ;;  %v309_v6 = vld [vmem:[#allocation3 + $0x58] sm:$0xff]  ;;  %v411_v7 = vld [vmem:[#allocation5 + $0x70] sm:$0xff]  ;;  %v410_v8 = vld [vmem:[#allocation5 + $0x68] sm:$0xff] }
  0x2e   : > { %649 = vmatpush3.msra.mxu0 %v313_v1  ;;  %684 = vmatpush3.msra.mxu1 %v412_v5  ;;  %v308_v9 = vld [vmem:[#allocation3 + $0x50] sm:$0xff]  ;;  %v409_v10 = vld [vmem:[#allocation5 + $0x60] sm:$0xff]  ;;  %v307_v11 = vld [vmem:[#allocation3 + $0x48] sm:$0xff]  ;;  %s1032_s18 = smov (!%p280_p3, %s843_s18), 1 }
  0x2f   : > { %650 = vmatprep.subr.mxu0 %v857_v0  ;;  %685 = vmatprep.subr.mxu1 %v857_v0  ;;  %v306_v12 = vld [vmem:[#allocation3 + $0x40] sm:$0xff]  ;;  %v305_v13 = vld [vmem:[#allocation3 + $0x38] sm:$0xff]  ;;  %v304_v14 = vld [vmem:[#allocation3 + $0x30] sm:$0xff]  ;;  %s608_s13 = sshll.u32 %s1032_s18, 3 }
  0x30   : > { %651 = vmatpush3.msra.mxu0 %v312_v2  ;;  %686 = vmatpush3.msra.mxu1 %v411_v7  ;;  %v303_v15 = vld [vmem:[#allocation3 + $0x28] sm:$0xff]  ;;  %v302_v16 = vld [vmem:[#allocation3 + $0x20] sm:$0xff]  ;;  %v301_v17 = vld [vmem:[#allocation3 + $0x18] sm:$0xff]  ;;  %s283_s16 = scalar_lea.vmem %s1018_s0, %s608_s13  ;;  %s291_s27 = scalar_lea.vmem %s1023_s5, %s608_s13 }
  0x31   : > { %652 = vmatprep.subr.mxu0 %v857_v0  ;;  %687 = vmatprep.subr.mxu1 %v857_v0  ;;  %v300_v18 = vld [vmem:[#allocation3 + $0x10] sm:$0xff]  ;;  %v299_v19 = vld [vmem:[#allocation3 + $0x8] sm:$0xff]  ;;  %v298_v20 = vld [vmem:[#allocation3] sm:$0xff] }
  0x32   : > { %653 = vmatpush3.msra.mxu0 %v311_v3  ;;  %688 = vmatpush3.msra.mxu1 %v410_v8  ;;  %v297_v21 = vld [vmem:[%s283_s16] sm:$0xff]  ;;  %v408_v22 = vld [vmem:[#allocation5 + $0x58] sm:$0xff]  ;;  %v407_v23 = vld [vmem:[#allocation5 + $0x50] sm:$0xff] }
  0x33   : > { %654 = vmatprep.subr.mxu0 %v857_v0  ;;  %689 = vmatprep.subr.mxu1 %v857_v0  ;;  %v406_v24 = vld [vmem:[#allocation5 + $0x48] sm:$0xff]  ;;  %v405_v25 = vld [vmem:[#allocation5 + $0x40] sm:$0xff]  ;;  %v404_v26 = vld [vmem:[#allocation5 + $0x38] sm:$0xff] }
  0x34   : > { %655 = vmatpush3.msra.mxu0 %v310_v4  ;;  %690 = vmatpush3.msra.mxu1 %v409_v10  ;;  %v403_v27 = vld [vmem:[#allocation5 + $0x30] sm:$0xff]  ;;  %v402_v28 = vld [vmem:[#allocation5 + $0x28] sm:$0xff]  ;;  %v401_v29 = vld [vmem:[#allocation5 + $0x20] sm:$0xff] }
  0x35   : > { %656 = vmatprep.subr.mxu0 %v857_v0  ;;  %691 = vmatprep.subr.mxu1 %v857_v0  ;;  %v400_v30 = vld [vmem:[#allocation5 + $0x18] sm:$0xff]  ;;  %v399_v31 = vld [vmem:[#allocation5 + $0x10] sm:$0xff]  ;;  %v398_v32 = vld [vmem:[#allocation5 + $0x8] sm:$0xff] }
  0x36   : > { %657 = vmatpush3.msra.mxu0 %v309_v6  ;;  %692 = vmatpush3.msra.mxu1 %v408_v22  ;;  %v397_v33 = vld [vmem:[#allocation5] sm:$0xff] }
  0x37   : > { %658 = vmatprep.subr.mxu0 %v857_v0  ;;  %693 = vmatprep.subr.mxu1 %v857_v0  ;;  %v610_v34 = vld [vmem:[%s1020_s2] ss:$0 sm:$0xff] }
  0x38   : > { %659 = vmatpush3.msra.mxu0 %v308_v9  ;;  %694 = vmatpush3.msra.mxu1 %v407_v23  ;;  %v611_v43 = vld [vmem:[%s1022_s4] ss:$0 sm:$0xff] }
  0x39   : > { %660 = vmatprep.subr.mxu0 %v857_v0  ;;  %695 = vmatprep.subr.mxu1 %v857_v0 }
  0x3a   : > { %661 = vmatpush3.msra.mxu0 %v307_v11  ;;  %696 = vmatpush3.msra.mxu1 %v406_v24 }
  0x3b   : > { %662 = vmatprep.subr.mxu0 %v857_v0  ;;  %697 = vmatprep.subr.mxu1 %v857_v0 }
  0x3c   : > { %663 = vmatpush3.msra.mxu0 %v306_v12  ;;  %698 = vmatpush3.msra.mxu1 %v405_v25 }
  0x3d   : > { %664 = vmatprep.subr.mxu0 %v857_v0  ;;  %699 = vmatprep.subr.mxu1 %v857_v0 }
  0x3e   : > { %665 = vmatpush3.msra.mxu0 %v305_v13  ;;  %700 = vmatpush3.msra.mxu1 %v404_v26 }
  0x3f   : > { %666 = vmatprep.subr.mxu0 %v857_v0  ;;  %701 = vmatprep.subr.mxu1 %v857_v0 }
  0x40   : > { %667 = vmatpush3.msra.mxu0 %v304_v14  ;;  %702 = vmatpush3.msra.mxu1 %v403_v27 }
  0x41   : > { %668 = vmatprep.subr.mxu0 %v857_v0  ;;  %703 = vmatprep.subr.mxu1 %v857_v0 }
  0x42   : > { %669 = vmatpush3.msra.mxu0 %v303_v15  ;;  %704 = vmatpush3.msra.mxu1 %v402_v28 }
  0x43   : > { %670 = vmatprep.subr.mxu0 %v857_v0  ;;  %705 = vmatprep.subr.mxu1 %v857_v0 }
  0x44   : > { %671 = vmatpush3.msra.mxu0 %v302_v16  ;;  %706 = vmatpush3.msra.mxu1 %v401_v29 }
  0x45   : > { %672 = vmatprep.subr.mxu0 %v857_v0  ;;  %707 = vmatprep.subr.mxu1 %v857_v0 }
  0x46   : > { %673 = vmatpush3.msra.mxu0 %v301_v17  ;;  %708 = vmatpush3.msra.mxu1 %v400_v30 }
  0x47   : > { %674 = vmatprep.subr.mxu0 %v857_v0  ;;  %709 = vmatprep.subr.mxu1 %v857_v0 }
  0x48   : > { %675 = vmatpush3.msra.mxu0 %v300_v18  ;;  %710 = vmatpush3.msra.mxu1 %v399_v31 }
  0x49   : > { %676 = vmatprep.subr.mxu0 %v857_v0  ;;  %711 = vmatprep.subr.mxu1 %v857_v0 }
  0x4a   : > { %677 = vmatpush3.msra.mxu0 %v299_v19  ;;  %712 = vmatpush3.msra.mxu1 %v398_v32 }
  0x4b   : > { %678 = vmatprep.subr.mxu0 %v857_v0  ;;  %713 = vmatprep.subr.mxu1 %v857_v0 }
  0x4c   : > { %679 = vmatpush3.msra.mxu0 %v298_v20  ;;  %714 = vmatpush3.msra.mxu1 %v397_v33 }
  0x4d   : > { %681 = vmatmul.mubr.f32.vlgmr.msra.gmra.mxu0 %v297_v21 }
 0x10d   : > { %v387_v35 = vpop.f32.mrf.mxu0 }
 0x10e   : > { %v388_v36 = vadd.f32 %v610_v34, %v387_v35 }
 0x10f   : > { %v682_v37 = vpop.f32.mrf.mxu0 }
 0x110   : > { %v392_v38 = vmul.f32 0.70710677, %v388_v36  ;;  %v391_v40 = vmul.f32 0.5, %v388_v36 }
 0x112   : > { %767 = verf.f32 %v392_v38 }
 0x11f   : > { %v768_v39 = vpop.eup %767 }
 0x120   : > { %v394_v41 = vadd.f32 1.0, %v768_v39 }
 0x122   : > { %v395_v42 = vmul.f32 %v394_v41, %v391_v40 }
 0x124   : > { %716 = vmatmul.mubr.f32.vlgmr.msra.gmra.mxu1 %v395_v42 }
 0x1e4   : > { %v479_v44 = vpop.f32.mrf.mxu1 }
 0x1e5   : > { %v496_v45 = vadd.f32 %v611_v43, %v479_v44 }
 0x1e6   : > { %v717_v46 = vpop.f32.mrf.mxu1 }
 0x1e7   : > { %497 = vst [vmem:[%s291_s27] sm:$0xff] %v496_v45 }
 0x1e8 PF: > { %s17_s20 = sadd.s32 1, %s851_s20   ;;  %s1027_s18 = smov %s847_s19 }
 0x1e9   : > { %p14_p4 = scmp.ge.s32.totalorder %s17_s20, 4   ;;  %s1028_s19 = smov %s1030_s22 }
 0x1eb   :  { %16 = sbr.rel (!%p14_p4) target bundleno = 3 (0x3), region = 92 }
 0x1f0   :  { %517 = vsyncpa [#allocation4], 1 }
 0x1f1   :  { %519 = vsyncpa [#allocation4 + $0x1], 1 }
 0x1f2   :  { %520 = vsyncpa [#allocation6], 1 }

// kernel: mlp_forward.1
= control target key start
LH: loop header
LB: loop body
LE: loop exit
PB: predicated region body
PF: predicated region fallthrough
CT: control target
= control target key end

     0   :  { %10 = vsyncpa [#allocation4], 0  ;;  %s1018_s0 = inlined_call_operand.vmem [shape: f32[16,128], index: 0, kind: input, shape index: {}]   ;;  %s1019_s1 = inlined_call_operand.hbm [shape: f32[128,128], index: 1, kind: input, shape index: {}]   ;;  %s1020_s2 = inlined_call_operand.vmem [shape: f32[1,128], index: 2, kind: input, shape index: {}]   ;;  %s1021_s3 = inlined_call_operand.hbm [shape: f32[128,128], index: 3, kind: input, shape index: {}]   ;;  %s1022_s4 = inlined_call_operand.vmem [shape: f32[1,128], index: 4, kind: input, shape index: {}]   ;;  %s1023_s5 = inlined_call_operand.vmem [shape: f32[16,128], index: 5, kind: output, shape index: {}]  }
   0x1   :  { %11 = vsyncpa [#allocation6], 0  ;;  %s889_s18 = smov 0   ;;  %s891_s19 = smov 0  }
   0x2   :  { %s893_s20 = smov 0  }
   0x3 LB: > { %s598_s21 = sadd.s32 4294967295, %s851_s20   ;;  %s29_s22 = sadd.s32 1, %s847_s19  ;;  %s851_s20 = sphi %s893_s20, %s17_s20   ;;  %s847_s19 = sphi %s891_s19, %s1028_s19   ;;  %s843_s18 = sphi %s889_s18, %s1027_s18  }
   0x4   : > { %p31_p0 = scmp.ge.s32.totalorder %s29_s22, 2  ;;  %p600_p1 = scmp.ge.s32.totalorder %s851_s20, 1 }
   0x5   : > { %p185_p2 = scmp.lt.s32.totalorder %s851_s20, 3  ;;  %p914_p4 = scmp.eq.s32.totalorder %s598_s21, 0 }
   0x6   : > { %s1030_s22 = smov (%p31_p0, %s29_s22), 0  ;;  %s853_s25 = smov [#allocation3]  }
   0x7   : > { %p910_p3 = pnand %p600_p1, %p185_p2  ;;  %s199_s26 = sshll.u32 %s853_s25, 4  ;;  %s200_s26 = int_to_ptr.vmem [resolvable:$true] %s199_s26 }
   0x8   : > { %s854_s28 = smov [#allocation5]   ;;  %s780_s30 = scalar_lea.vmem %s200_s26, 2048 }
   0x9   : > { %p726_p5 = pneg %p910_p3  ;;  %s221_s29 = sshll.u32 %s854_s28, 4  ;;  %s222_s29 = int_to_ptr.vmem [resolvable:$true] %s221_s29 }
   0xa   : > { %p781_p8 = scmp.ne.s32.totalorder %s200_s26, %s780_s30  ;;  %p788_p11 = scmp.lt.s32.totalorder %s200_s26, %s200_s26 }
   0xb   : > { %p922_p6 = pnand %p914_p4, %p726_p5  ;;  %p789_p12 = scmp.lt.s32.totalorder %s780_s30, %s780_s30 }
   0xd   : > { %p771_p7 = pneg %p922_p6  ;;  %p790_p13 = por %p789_p12, %p788_p11 }
   0xf   : > { %p783_p9 = pnand %p781_p8, %p771_p7 }
  0x11   : > { %p784_p10 = pneg %p783_p9 }
  0x13   : > { %p791_p0 = pnand %p790_p13, %p784_p10 }
  0x15   : > { %794 = shalt.err (!%p791_p0)
}
  0x16   : > { %s855_s6 = smov 128   ;;  %s856_s7 = smov 8  }
  0x17   : > { %729 = dma.hbm_to_vmem [thread:$0]  (!%p922_p6), %s1019_s1, 2048, %s200_s26, [#allocation4], %s855_s6, %s855_s6, %s856_s7  }
  0x18   : > { %s806_s10 = scalar_lea.vmem %s222_s29, 2048  ;;  %p814_p8 = scmp.lt.s32.totalorder %s222_s29, %s222_s29 }
  0x19   : > { %p807_p1 = scmp.ne.s32.totalorder %s222_s29, %s806_s10  ;;  %p815_p9 = scmp.lt.s32.totalorder %s806_s10, %s806_s10 }
  0x1b   : > { %p809_p2 = pnand %p807_p1, %p771_p7  ;;  %p816_p11 = por %p815_p9, %p814_p8 }
  0x1d   : > { %p810_p5 = pneg %p809_p2 }
  0x1f   : > { %p817_p10 = pnand %p816_p11, %p810_p5 }
  0x21   : > { %820 = shalt.err (!%p817_p10)
}
  0x22   : > { %732 = dma.hbm_to_vmem [thread:$0]  (!%p922_p6), %s1021_s3, 2048, %s222_s29, [#allocation6], %s855_s6, %s855_s6, %s856_s7  }
  0x23   : > { %247 = sbr.rel (%p910_p3) target bundleno = 488 (0x1e8), region = 40 }
  0x28   : > { %834 = dma.done.wait (%p914_p4), [#allocation4], 2048  }
  0x29   : > { %836 = vsyncadd (%p914_p4), [#allocation4], 4294965248 }
  0x2a   : > { %838 = dma.done.wait (%p914_p4), [#allocation6], 2048  }
  0x2b   : > { %840 = vsyncadd (%p914_p4), [#allocation6], 4294965248  ;;  %v857_v0 = vmov 0.0   ;;  %vm858_vm0 = vmmov 0   ;;  %v313_v1 = vld [vmem:[#allocation3 + $0x78] sm:$0xff]  ;;  %v312_v2 = vld [vmem:[#allocation3 + $0x70] sm:$0xff] }
  0x2c   : > { %648 = vmatprep.subr.mxu0 %v857_v0  ;;  %680 = vmatprep.mubr.msk.f32.mxu0 %vm858_vm0, %v857_v0  ;;  %v311_v3 = vld [vmem:[#allocation3 + $0x68] sm:$0xff]  ;;  %v310_v4 = vld [vmem:[#allocation3 + $0x60] sm:$0xff]  ;;  %v412_v5 = vld [vmem:[#allocation5 + $0x78] sm:$0xff]  ;;  %p280_p3 = scmp.lt.s32.totalorder %s843_s18, 1 }
  0x2d   : > { %683 = vmatprep.subr.mxu1 %v857_v0  ;;  %715 = vmatprep.mubr.msk.f32.mxu1 %vm858_vm0, %v857_v0  ;;  %v309_v6 = vld [vmem:[#allocation3 + $0x58] sm:$0xff]  ;;  %v411_v7 = vld [vmem:[#allocation5 + $0x70] sm:$0xff]  ;;  %v410_v8 = vld [vmem:[#allocation5 + $0x68] sm:$0xff] }
  0x2e   : > { %649 = vmatpush3.msra.mxu0 %v313_v1  ;;  %684 = vmatpush3.msra.mxu1 %v412_v5  ;;  %v308_v9 = vld [vmem:[#allocation3 + $0x50] sm:$0xff]  ;;  %v409_v10 = vld [vmem:[#allocation5 + $0x60] sm:$0xff]  ;;  %v307_v11 = vld [vmem:[#allocation3 + $0x48] sm:$0xff]  ;;  %s1032_s18 = smov (!%p280_p3, %s843_s18), 1 }
  0x2f   : > { %650 = vmatprep.subr.mxu0 %v857_v0  ;;  %685 = vmatprep.subr.mxu1 %v857_v0  ;;  %v306_v12 = vld [vmem:[#allocation3 + $0x40] sm:$0xff]  ;;  %v305_v13 = vld [vmem:[#allocation3 + $0x38] sm:$0xff]  ;;  %v304_v14 = vld [vmem:[#allocation3 + $0x30] sm:$0xff]  ;;  %s608_s13 = sshll.u32 %s1032_s18, 3 }
  0x30   : > { %651 = vmatpush3.msra.mxu0 %v312_v2  ;;  %686 = vmatpush3.msra.mxu1 %v411_v7  ;;  %v303_v15 = vld [vmem:[#allocation3 + $0x28] sm:$0xff]  ;;  %v302_v16 = vld [vmem:[#allocation3 + $0x20] sm:$0xff]  ;;  %v301_v17 = vld [vmem:[#allocation3 + $0x18] sm:$0xff]  ;;  %s283_s16 = scalar_lea.vmem %s1018_s0, %s608_s13  ;;  %s291_s27 = scalar_lea.vmem %s1023_s5, %s608_s13 }
  0x31   : > { %652 = vmatprep.subr.mxu0 %v857_v0  ;;  %687 = vmatprep.subr.mxu1 %v857_v0  ;;  %v300_v18 = vld [vmem:[#allocation3 + $0x10] sm:$0xff]  ;;  %v299_v19 = vld [vmem:[#allocation3 + $0x8] sm:$0xff]  ;;  %v298_v20 = vld [vmem:[#allocation3] sm:$0xff] }
  0x32   : > { %653 = vmatpush3.msra.mxu0 %v311_v3  ;;  %688 = vmatpush3.msra.mxu1 %v410_v8  ;;  %v297_v21 = vld [vmem:[%s283_s16] sm:$0xff]  ;;  %v408_v22 = vld [vmem:[#allocation5 + $0x58] sm:$0xff]  ;;  %v407_v23 = vld [vmem:[#allocation5 + $0x50] sm:$0xff] }
  0x33   : > { %654 = vmatprep.subr.mxu0 %v857_v0  ;;  %689 = vmatprep.subr.mxu1 %v857_v0  ;;  %v406_v24 = vld [vmem:[#allocation5 + $0x48] sm:$0xff]  ;;  %v405_v25 = vld [vmem:[#allocation5 + $0x40] sm:$0xff]  ;;  %v404_v26 = vld [vmem:[#allocation5 + $0x38] sm:$0xff] }
  0x34   : > { %655 = vmatpush3.msra.mxu0 %v310_v4  ;;  %690 = vmatpush3.msra.mxu1 %v409_v10  ;;  %v403_v27 = vld [vmem:[#allocation5 + $0x30] sm:$0xff]  ;;  %v402_v28 = vld [vmem:[#allocation5 + $0x28] sm:$0xff]  ;;  %v401_v29 = vld [vmem:[#allocation5 + $0x20] sm:$0xff] }
  0x35   : > { %656 = vmatprep.subr.mxu0 %v857_v0  ;;  %691 = vmatprep.subr.mxu1 %v857_v0  ;;  %v400_v30 = vld [vmem:[#allocation5 + $0x18] sm:$0xff]  ;;  %v399_v31 = vld [vmem:[#allocation5 + $0x10] sm:$0xff]  ;;  %v398_v32 = vld [vmem:[#allocation5 + $0x8] sm:$0xff] }
  0x36   : > { %657 = vmatpush3.msra.mxu0 %v309_v6  ;;  %692 = vmatpush3.msra.mxu1 %v408_v22  ;;  %v397_v33 = vld [vmem:[#allocation5] sm:$0xff] }
  0x37   : > { %658 = vmatprep.subr.mxu0 %v857_v0  ;;  %693 = vmatprep.subr.mxu1 %v857_v0  ;;  %v610_v34 = vld [vmem:[%s1020_s2] ss:$0 sm:$0xff] }
  0x38   : > { %659 = vmatpush3.msra.mxu0 %v308_v9  ;;  %694 = vmatpush3.msra.mxu1 %v407_v23  ;;  %v611_v43 = vld [vmem:[%s1022_s4] ss:$0 sm:$0xff] }
  0x39   : > { %660 = vmatprep.subr.mxu0 %v857_v0  ;;  %695 = vmatprep.subr.mxu1 %v857_v0 }
  0x3a   : > { %661 = vmatpush3.msra.mxu0 %v307_v11  ;;  %696 = vmatpush3.msra.mxu1 %v406_v24 }
  0x3b   : > { %662 = vmatprep.subr.mxu0 %v857_v0  ;;  %697 = vmatprep.subr.mxu1 %v857_v0 }
  0x3c   : > { %663 = vmatpush3.msra.mxu0 %v306_v12  ;;  %698 = vmatpush3.msra.mxu1 %v405_v25 }
  0x3d   : > { %664 = vmatprep.subr.mxu0 %v857_v0  ;;  %699 = vmatprep.subr.mxu1 %v857_v0 }
  0x3e   : > { %665 = vmatpush3.msra.mxu0 %v305_v13  ;;  %700 = vmatpush3.msra.mxu1 %v404_v26 }
  0x3f   : > { %666 = vmatprep.subr.mxu0 %v857_v0  ;;  %701 = vmatprep.subr.mxu1 %v857_v0 }
  0x40   : > { %667 = vmatpush3.msra.mxu0 %v304_v14  ;;  %702 = vmatpush3.msra.mxu1 %v403_v27 }
  0x41   : > { %668 = vmatprep.subr.mxu0 %v857_v0  ;;  %703 = vmatprep.subr.mxu1 %v857_v0 }
  0x42   : > { %669 = vmatpush3.msra.mxu0 %v303_v15  ;;  %704 = vmatpush3.msra.mxu1 %v402_v28 }
  0x43   : > { %670 = vmatprep.subr.mxu0 %v857_v0  ;;  %705 = vmatprep.subr.mxu1 %v857_v0 }
  0x44   : > { %671 = vmatpush3.msra.mxu0 %v302_v16  ;;  %706 = vmatpush3.msra.mxu1 %v401_v29 }
  0x45   : > { %672 = vmatprep.subr.mxu0 %v857_v0  ;;  %707 = vmatprep.subr.mxu1 %v857_v0 }
  0x46   : > { %673 = vmatpush3.msra.mxu0 %v301_v17  ;;  %708 = vmatpush3.msra.mxu1 %v400_v30 }
  0x47   : > { %674 = vmatprep.subr.mxu0 %v857_v0  ;;  %709 = vmatprep.subr.mxu1 %v857_v0 }
  0x48   : > { %675 = vmatpush3.msra.mxu0 %v300_v18  ;;  %710 = vmatpush3.msra.mxu1 %v399_v31 }
  0x49   : > { %676 = vmatprep.subr.mxu0 %v857_v0  ;;  %711 = vmatprep.subr.mxu1 %v857_v0 }
  0x4a   : > { %677 = vmatpush3.msra.mxu0 %v299_v19  ;;  %712 = vmatpush3.msra.mxu1 %v398_v32 }
  0x4b   : > { %678 = vmatprep.subr.mxu0 %v857_v0  ;;  %713 = vmatprep.subr.mxu1 %v857_v0 }
  0x4c   : > { %679 = vmatpush3.msra.mxu0 %v298_v20  ;;  %714 = vmatpush3.msra.mxu1 %v397_v33 }
  0x4d   : > { %681 = vmatmul.mubr.f32.vlgmr.msra.gmra.mxu0 %v297_v21 }
 0x10d   : > { %v387_v35 = vpop.f32.mrf.mxu0 }
 0x10e   : > { %v388_v36 = vadd.f32 %v610_v34, %v387_v35 }
 0x10f   : > { %v682_v37 = vpop.f32.mrf.mxu0 }
 0x110   : > { %v392_v38 = vmul.f32 0.70710677, %v388_v36  ;;  %v391_v40 = vmul.f32 0.5, %v388_v36 }
 0x112   : > { %767 = verf.f32 %v392_v38 }
 0x11f   : > { %v768_v39 = vpop.eup %767 }
 0x120   : > { %v394_v41 = vadd.f32 1.0, %v768_v39 }
 0x122   : > { %v395_v42 = vmul.f32 %v394_v41, %v391_v40 }
 0x124   : > { %716 = vmatmul.mubr.f32.vlgmr.msra.gmra.mxu1 %v395_v42 }
 0x1e4   : > { %v479_v44 = vpop.f32.mrf.mxu1 }
 0x1e5   : > { %v496_v45 = vadd.f32 %v611_v43, %v479_v44 }
 0x1e6   : > { %v717_v46 = vpop.f32.mrf.mxu1 }
 0x1e7   : > { %497 = vst [vmem:[%s291_s27] sm:$0xff] %v496_v45 }
 0x1e8 PF: > { %s17_s20 = sadd.s32 1, %s851_s20   ;;  %s1027_s18 = smov %s847_s19 }
 0x1e9   : > { %p14_p4 = scmp.ge.s32.totalorder %s17_s20, 4   ;;  %s1028_s19 = smov %s1030_s22 }
 0x1eb   :  { %16 = sbr.rel (!%p14_p4) target bundleno = 3 (0x3), region = 92 }
 0x1f0   :  { %517 = vsyncpa [#allocation4], 1 }
 0x1f1   :  { %519 = vsyncpa [#allocation4 + $0x1], 1 }
 0x1f2   :  { %520 = vsyncpa [#allocation6], 1 }

</bundles_post_ra>
